<compile_context>
chip_gen: v5e
topology: v5e:2x2
jax: 0.10.0
libtpu: 0.0.40
codegen_flags: <defaults>
</compile_context>

<pallas_src>
import jax
import jax.numpy as jnp
from jax import lax
from jax.experimental import pallas as pl
from jax.experimental.pallas import tpu as pltpu


def _global_attention_kernel(lens_ref, x_ref, ctx_ref, w_in_t_ref,
                             w_out_ctx_ref, w_out_x_ref, out_ref, attn_ref):
    bblk, T, D = x_ref.shape
    S = ctx_ref.shape[1]

    x = x_ref[...]                       # (Bblk, T, D) native dtype (bf16 ok)
    ctx = ctx_ref[...]                   # (Bblk, S, D)
    x2 = x.reshape(bblk * T, D)          # leading-dim collapse: layout-free

    # linear_in over all Bblk*T rows at once (weight pre-transposed -> plain
    # [M,K]x[K,N], no per-step XLU transpose), f32 accumulation on the MXU.
    target = jnp.dot(x2, w_in_t_ref[...],
                     preferred_element_type=jnp.float32)        # (Bblk*T, D)
    target = target.astype(x.dtype).reshape(bblk, T, D)

    # scores[b,t,s] = <target[b,t], ctx[b,s]>  (batched bmm, f32 accumulate).
    scores = jnp.einsum('btd,bsd->bts', target, ctx,
                        preferred_element_type=jnp.float32)     # (Bblk,T,S)

    # Attention mask (GlobalAttention.applyMask): additive -1e30 bias on
    # source positions >= src_len, built from SMEM scalars (cheap VPU select).
    base = pl.program_id(0) * bblk
    col = lax.broadcasted_iota(jnp.int32, (1, S), 1)
    bias_rows = [
        jnp.where(col < lens_ref[base + bb],
                  jnp.float32(0.0), jnp.float32(-1e30))
        for bb in range(bblk)
    ]
    bias = jnp.concatenate(bias_rows, axis=0)                   # (Bblk, S) f32
    scores = scores + bias[:, None, :]

    # Softmax over source length, entirely in f32, exact reciprocal.
    m = jnp.max(scores, axis=-1, keepdims=True)
    p = jnp.exp(scores - m)
    attn = p / jnp.sum(p, axis=-1, keepdims=True)               # (Bblk,T,S)

    # weighted[b,t,d] = sum_s attn[b,t,s] * ctx[b,s,d]
    weighted = jnp.einsum('bts,bsd->btd', attn.astype(ctx.dtype), ctx,
                          preferred_element_type=jnp.float32)   # (Bblk,T,D)

    # linear_out without the concat: two K=D matmuls accumulating in f32.
    #   out = tanh([weighted, x] @ w_out.T)
    #       = tanh(weighted @ w_out[:, :D].T + x @ w_out[:, D:].T)
    pre = jnp.dot(weighted.astype(x.dtype).reshape(bblk * T, D),
                  w_out_ctx_ref[...], preferred_element_type=jnp.float32)
    pre = pre + jnp.dot(x2, w_out_x_ref[...],
                        preferred_element_type=jnp.float32)
    out = jnp.tanh(pre).reshape(bblk, T, D)

    out_ref[...] = out.astype(out_ref.dtype)
    # NOTE: S < 128 makes this a masked (lane-sparse) store; pad S to a
    # multiple of 128, or skip this output, if it shows up in profiles.
    attn_ref[...] = attn.astype(attn_ref.dtype)


def _pick_block_batch(B, T, rows_target=256, min_grid=2):
    """Batch elements per grid step: aim for Bblk*T >= rows_target MXU rows
    (256 for v6e/v7x, still a big win on v5e's 128-wide MXU) while keeping at
    least `min_grid` grid steps so v7x's two TensorCores both get work."""
    divisors = [d for d in range(1, B + 1) if B % d == 0]
    for d in divisors:
        if d * T >= rows_target and B // d >= min_grid:
            return d
    for d in reversed(divisors):
        if B // d >= min_grid:
            return d
    return B


def global_attention(attn_input, context, w_in, w_out, src_lens=None):
    """GlobalAttention forward for one or many decoder timesteps.

    attn_input: (B, D) or (B, T, D) decoder hidden state(s)
    context:    (B, S, D)           encoder outputs
    w_in:       (D, D)    nn.Linear(D, D,  bias=False).weight
    w_out:      (D, 2D)   nn.Linear(2D, D, bias=False).weight
    src_lens:   optional (B,) int32 valid source lengths (applyMask)
    Returns (context_output, attn) with the same time layout as attn_input.
    """
    squeeze_t = attn_input.ndim == 2
    if squeeze_t:
        # TODO(synk): for real decode loops, batch timesteps or fuse this into
        # the surrounding decoder-step kernel; a standalone T=1 call is
        # launch/weight-DMA bound rather than MXU bound.
        attn_input = attn_input[:, None, :]
    B, T, D = attn_input.shape
    _, S, _ = context.shape
    dtype = attn_input.dtype

    context = context.astype(dtype)
    # One-time weight prep (static per model): PyTorch nn.Linear weights are
    # (out, in); pre-transpose so the kernel does plain [M,K]x[K,N] matmuls,
    # and split linear_out's K=2D weight into its context / input halves so no
    # concat is needed in-kernel.
    w_in_t = w_in.astype(dtype).T                     # (D, D)
    w_out = w_out.astype(dtype)
    w_out_ctx_t = w_out[:, :D].T                      # (D, D), multiplies weighted ctx
    w_out_x_t = w_out[:, D:].T                        # (D, D), multiplies x

    if src_lens is None:
        src_lens = jnp.full((B,), S, dtype=jnp.int32)
    else:
        src_lens = src_lens.astype(jnp.int32)

    bblk = _pick_block_batch(B, T)
    grid = (B // bblk,)

    itemsize = jnp.dtype(dtype).itemsize
    cost = pl.CostEstimate(
        flops=2 * B * T * D * (3 * D + 2 * S),          # lin_in + 2 bmm + lin_out
        transcendentals=B * T * (S + D),                # exp + tanh
        bytes_accessed=((2 * B * T * D + B * S * D + B * T * S) * itemsize
                        + 3 * D * D * itemsize + 4 * B),
    )

    # VMEM footprint per step is tiny here (< 1 MiB); when scaling Bblk/S for
    # real encoder lengths, re-budget against v7x's 64 MiB VMEM and set
    # vmem_limit_bytes in CompilerParams explicitly.
    out, attn = pl.pallas_call(
        _global_attention_kernel,
        out_shape=(jax.ShapeDtypeStruct((B, T, D), dtype),
                   jax.ShapeDtypeStruct((B, T, S), dtype)),
        grid_spec=pltpu.PrefetchScalarGridSpec(
            num_scalar_prefetch=1,          # src_lens -> SMEM
            grid=grid,
            in_specs=[
                pl.BlockSpec((bblk, T, D), lambda b, lens: (b, 0, 0)),  # x
                pl.BlockSpec((bblk, S, D), lambda b, lens: (b, 0, 0)),  # context
                pl.BlockSpec((D, D), lambda b, lens: (0, 0)),           # w_in^T
                pl.BlockSpec((D, D), lambda b, lens: (0, 0)),           # w_out ctx-half^T
                pl.BlockSpec((D, D), lambda b, lens: (0, 0)),           # w_out x-half^T
            ],
            out_specs=(
                pl.BlockSpec((bblk, T, D), lambda b, lens: (b, 0, 0)),
                pl.BlockSpec((bblk, T, S), lambda b, lens: (b, 0, 0)),
            ),
        ),
        compiler_params=pltpu.CompilerParams(
            dimension_semantics=("parallel",)),
        cost_estimate=cost,
    )(src_lens, attn_input, context, w_in_t, w_out_ctx_t, w_out_x_t)

    if squeeze_t:
        out = out[:, 0, :]
        attn = attn[:, 0, :]
    return out, attn


def reference(attn_input, context, w_in, w_out, src_lens=None):
    """Pure-JAX f32 reference matching the PyTorch GlobalAttention forward."""
    hi = jax.lax.Precision.HIGHEST
    x = attn_input.astype(jnp.float32)
    ctx = context.astype(jnp.float32)
    w_in = w_in.astype(jnp.float32)
    w_out = w_out.astype(jnp.float32)
    target = jnp.einsum('btd,ed->bte', x, w_in, precision=hi)        # linear_in
    scores = jnp.einsum('bsd,btd->bts', ctx, target, precision=hi)   # bmm
    if src_lens is not None:
        col = jnp.arange(ctx.shape[1])[None, None, :]
        scores = jnp.where(col < src_lens[:, None, None], scores, -1e30)
    attn = jax.nn.softmax(scores, axis=-1)
    weighted = jnp.einsum('bts,bsd->btd', attn, ctx, precision=hi)   # bmm
    combined = jnp.concatenate([weighted, x], axis=-1)
    out = jnp.tanh(jnp.einsum('btk,dk->btd', combined, w_out, precision=hi))
    return out, attn


if __name__ == "__main__":
    # Small, lane-dense shapes: D=128 keeps the main stores unmasked; B=4
    # sequences with T=8 decoder timesteps batched per call so each grid step
    # feeds Bblk*T rows into the MXU.
    B, T, S, D = 4, 8, 16, 128
    key = jax.random.PRNGKey(0)
    k1, k2, k3, k4 = jax.random.split(key, 4)

    attn_input = jax.random.normal(k1, (B, T, D), dtype=jnp.float32)
    context = jax.random.normal(k2, (B, S, D), dtype=jnp.float32)
    w_in = 0.1 * jax.random.normal(k3, (D, D), dtype=jnp.float32)
    w_out = 0.1 * jax.random.normal(k4, (D, 2 * D), dtype=jnp.float32)
    src_lens = jnp.array([S, 11, 7, 13], dtype=jnp.int32)   # padded batch

    # --- f32, masked, multi-timestep path -----------------------------------
    out, attn = global_attention(attn_input, context, w_in, w_out, src_lens)
    out = jax.block_until_ready(out)
    attn = jax.block_until_ready(attn)
    ref_out, ref_attn = reference(attn_input, context, w_in, w_out, src_lens)
    assert out.shape == (B, T, D) and attn.shape == (B, T, S)
    assert jnp.allclose(out, ref_out, atol=2e-3, rtol=2e-3)
    assert jnp.allclose(attn, ref_attn, atol=2e-3, rtol=2e-3)
    # Padded source positions must receive (essentially) zero attention.
    col = jnp.arange(S)[None, None, :]
    assert bool(jnp.all(jnp.where(col < src_lens[:, None, None], 0.0, attn)
                        <= 1e-6))

    # --- single-timestep (B, D) path, no mask -------------------------------
    out1, attn1 = global_attention(attn_input[:, 0, :], context, w_in, w_out)
    out1 = jax.block_until_ready(out1)
    r1_out, r1_attn = reference(attn_input[:, :1, :], context, w_in, w_out)
    assert jnp.allclose(out1, r1_out[:, 0, :], atol=2e-3, rtol=2e-3)
    assert jnp.allclose(attn1, r1_attn[:, 0, :], atol=2e-3, rtol=2e-3)

    # --- bf16 operands (per perf review): MXU-friendly mixed precision ------
    # Softmax and all matmul accumulation stay f32 in-kernel; outputs are bf16
    # (documented deviation from the f32 PyTorch reference).
    out_bf, attn_bf = global_attention(
        attn_input.astype(jnp.bfloat16), context.astype(jnp.bfloat16),
        w_in.astype(jnp.bfloat16), w_out.astype(jnp.bfloat16), src_lens)
    out_bf = jax.block_until_ready(out_bf)
    attn_bf = jax.block_until_ready(attn_bf)
    assert out_bf.dtype == jnp.bfloat16 and attn_bf.dtype == jnp.bfloat16
    assert bool(jnp.all(jnp.isfinite(out_bf.astype(jnp.float32))))
    row_sums = jnp.sum(attn_bf.astype(jnp.float32), axis=-1)
    assert bool(jnp.all(jnp.abs(row_sums - 1.0) < 2e-2))

    print("KERNEL_OK")
</pallas_src>

<mosaic_0001>
module attributes {stable_mosaic.version = 11 : i64} {
  func.func @_global_attention_kernel(%arg0: i32, %arg1: memref<4xi32, #tpu.memory_space<smem>>, %arg2: memref<2x8x128xf32, #tpu.memory_space<vmem>>, %arg3: memref<2x16x128xf32, #tpu.memory_space<vmem>>, %arg4: memref<128x128xf32, #tpu.memory_space<vmem>>, %arg5: memref<128x128xf32, #tpu.memory_space<vmem>>, %arg6: memref<128x128xf32, #tpu.memory_space<vmem>>, %arg7: memref<2x8x128xf32, #tpu.memory_space<vmem>>, %arg8: memref<2x8x16xf32, #tpu.memory_space<vmem>>) attributes {dimension_semantics = [#tpu.dimension_semantics<parallel>], iteration_bounds = array<i64: 2>, scalar_prefetch = 1 : i64, scratch_operands = 0 : i64, tpu.core_type = #tpu.core_type<tc>, window_params = [{transform_indices = @transform_0, window_bounds = array<i64: 2, 8, 128>}, {transform_indices = @transform_1, window_bounds = array<i64: 2, 16, 128>}, {pipeline_mode = #tpu.pipeline_mode<synchronous>, transform_indices = @transform_2, window_bounds = array<i64: 128, 128>}, {pipeline_mode = #tpu.pipeline_mode<synchronous>, transform_indices = @transform_3, window_bounds = array<i64: 128, 128>}, {pipeline_mode = #tpu.pipeline_mode<synchronous>, transform_indices = @transform_4, window_bounds = array<i64: 128, 128>}, {transform_indices = @transform_5, window_bounds = array<i64: 2, 8, 128>}, {transform_indices = @transform_6, window_bounds = array<i64: 2, 8, 16>}]} {
    %c0 = arith.constant 0 : index
    %c0_0 = arith.constant 0 : index
    %c0_1 = arith.constant 0 : index
    %0 = vector.load %arg2[%c0, %c0_0, %c0_1] : memref<2x8x128xf32, #tpu.memory_space<vmem>>, vector<2x8x128xf32>
    %c0_2 = arith.constant 0 : index
    %c0_3 = arith.constant 0 : index
    %c0_4 = arith.constant 0 : index
    %1 = vector.load %arg3[%c0_2, %c0_3, %c0_4] : memref<2x16x128xf32, #tpu.memory_space<vmem>>, vector<2x16x128xf32>
    %2 = vector.shape_cast %0 : vector<2x8x128xf32> to vector<16x128xf32>
    %c0_5 = arith.constant 0 : index
    %c0_6 = arith.constant 0 : index
    %3 = vector.load %arg4[%c0_5, %c0_6] : memref<128x128xf32, #tpu.memory_space<vmem>>, vector<128x128xf32>
    %cst = arith.constant dense<0.000000e+00> : vector<16x128xf32>
    %4 = tpu.matmul %2, %3, %cst {dimension_numbers = #tpu.dot_dimension_numbers<[1], [0], [0], [1], [0, 0, 1, 1], [], []>} : vector<16x128xf32>, vector<128x128xf32>, vector<16x128xf32> -> vector<16x128xf32>
    %5 = vector.shape_cast %4 : vector<16x128xf32> to vector<2x8x128xf32>
    "tpu.trace_start"() <{level = 10 : i32, message = "btd,bsd->bts"}> : () -> ()
    %cst_7 = arith.constant dense<0.000000e+00> : vector<2x8x16xf32>
    %6 = tpu.matmul %5, %1, %cst_7 {dimension_numbers = #tpu.dot_dimension_numbers<[2], [2], [1], [1], [0, 0, 0, 1, 1, 1], [0], [0]>} : vector<2x8x128xf32>, vector<2x16x128xf32>, vector<2x8x16xf32> -> vector<2x8x16xf32>
    "tpu.trace_stop"() : () -> ()
    %c2_i32 = arith.constant 2 : i32
    %7 = arith.muli %arg0, %c2_i32 : i32
    %8 = tpu.iota {dimensions = array<i32: 1>} : vector<1x16xi32>
    %c0_i32 = arith.constant 0 : i32
    %9 = arith.addi %7, %c0_i32 : i32
    %10 = arith.index_cast %9 : i32 to index
    %11 = memref.load %arg1[%10] : memref<4xi32, #tpu.memory_space<smem>>
    %12 = vector.broadcast %11 : i32 to vector<1x16xi32>
    %13 = arith.cmpi slt, %8, %12 : vector<1x16xi32>
    %cst_8 = arith.constant 0.000000e+00 : f32
    %cst_9 = arith.constant -1.000000e+30 : f32
    %14 = vector.broadcast %cst_8 : f32 to vector<1x16xf32>
    %15 = vector.broadcast %cst_9 : f32 to vector<1x16xf32>
    %16 = arith.select %13, %14, %15 : vector<1x16xi1>, vector<1x16xf32>
    %c1_i32 = arith.constant 1 : i32
    %17 = arith.addi %7, %c1_i32 : i32
    %18 = arith.index_cast %17 : i32 to index
    %19 = memref.load %arg1[%18] : memref<4xi32, #tpu.memory_space<smem>>
    %20 = vector.broadcast %19 : i32 to vector<1x16xi32>
    %21 = arith.cmpi slt, %8, %20 : vector<1x16xi32>
    %cst_10 = arith.constant 0.000000e+00 : f32
    %cst_11 = arith.constant -1.000000e+30 : f32
    %22 = vector.broadcast %cst_10 : f32 to vector<1x16xf32>
    %23 = vector.broadcast %cst_11 : f32 to vector<1x16xf32>
    %24 = arith.select %21, %22, %23 : vector<1x16xi1>, vector<1x16xf32>
    %25 = tpu.concatenate %16, %24 in 0 : vector<1x16xf32>, vector<1x16xf32> -> vector<2x16xf32>
    %26 = vector.shape_cast %25 : vector<2x16xf32> to vector<2x1x16xf32>
    %27 = vector.broadcast %26 : vector<2x1x16xf32> to vector<2x8x16xf32>
    %28 = arith.addf %6, %27 : vector<2x8x16xf32>
    %cst_12 = arith.constant dense<0xFF800000> : vector<2x8xf32>
    %29 = vector.multi_reduction <maximumf>, %28, %cst_12 [2] : vector<2x8x16xf32> to vector<2x8xf32>
    %30 = vector.shape_cast %29 : vector<2x8xf32> to vector<2x8x1xf32>
    %31 = vector.broadcast %30 : vector<2x8x1xf32> to vector<2x8x16xf32>
    %32 = arith.subf %28, %31 : vector<2x8x16xf32>
    %33 = math.exp %32 : vector<2x8x16xf32>
    %cst_13 = arith.constant dense<0.000000e+00> : vector<2x8xf32>
    %34 = vector.multi_reduction <add>, %33, %cst_13 [2] : vector<2x8x16xf32> to vector<2x8xf32>
    %35 = vector.shape_cast %34 : vector<2x8xf32> to vector<2x8x1xf32>
    %36 = vector.broadcast %35 : vector<2x8x1xf32> to vector<2x8x16xf32>
    %37 = arith.divf %33, %36 : vector<2x8x16xf32>
    "tpu.trace_start"() <{level = 10 : i32, message = "bts,bsd->btd"}> : () -> ()
    %cst_14 = arith.constant dense<0.000000e+00> : vector<2x8x128xf32>
    %38 = tpu.matmul %37, %1, %cst_14 {dimension_numbers = #tpu.dot_dimension_numbers<[2], [1], [1], [2], [0, 0, 0, 1, 1, 2], [0], [0]>} : vector<2x8x16xf32>, vector<2x16x128xf32>, vector<2x8x128xf32> -> vector<2x8x128xf32>
    "tpu.trace_stop"() : () -> ()
    %39 = vector.shape_cast %38 : vector<2x8x128xf32> to vector<16x128xf32>
    %c0_15 = arith.constant 0 : index
    %c0_16 = arith.constant 0 : index
    %40 = vector.load %arg5[%c0_15, %c0_16] : memref<128x128xf32, #tpu.memory_space<vmem>>, vector<128x128xf32>
    %cst_17 = arith.constant dense<0.000000e+00> : vector<16x128xf32>
    %41 = tpu.matmul %39, %40, %cst_17 {dimension_numbers = #tpu.dot_dimension_numbers<[1], [0], [0], [1], [0, 0, 1, 1], [], []>} : vector<16x128xf32>, vector<128x128xf32>, vector<16x128xf32> -> vector<16x128xf32>
    %c0_18 = arith.constant 0 : index
    %c0_19 = arith.constant 0 : index
    %42 = vector.load %arg6[%c0_18, %c0_19] : memref<128x128xf32, #tpu.memory_space<vmem>>, vector<128x128xf32>
    %cst_20 = arith.constant dense<0.000000e+00> : vector<16x128xf32>
    %43 = tpu.matmul %2, %42, %cst_20 {dimension_numbers = #tpu.dot_dimension_numbers<[1], [0], [0], [1], [0, 0, 1, 1], [], []>} : vector<16x128xf32>, vector<128x128xf32>, vector<16x128xf32> -> vector<16x128xf32>
    %44 = arith.addf %41, %43 : vector<16x128xf32>
    %45 = math.tanh %44 : vector<16x128xf32>
    %46 = vector.shape_cast %45 : vector<16x128xf32> to vector<2x8x128xf32>
    %c0_21 = arith.constant 0 : index
    %c0_22 = arith.constant 0 : index
    %c0_23 = arith.constant 0 : index
    %47 = vector.load %arg7[%c0_21, %c0_22, %c0_23] : memref<2x8x128xf32, #tpu.memory_space<vmem>>, vector<2x8x128xf32>
    tpu.vector_store %arg7[%c0_21, %c0_22, %c0_23], %46 {strides = array<i32>} : memref<2x8x128xf32, #tpu.memory_space<vmem>>, vector<2x8x128xf32>,
    %c0_24 = arith.constant 0 : index
    %c0_25 = arith.constant 0 : index
    %c0_26 = arith.constant 0 : index
    %48 = vector.load %arg8[%c0_24, %c0_25, %c0_26] : memref<2x8x16xf32, #tpu.memory_space<vmem>>, vector<2x8x16xf32>
    tpu.vector_store %arg8[%c0_24, %c0_25, %c0_26], %37 {strides = array<i32>} : memref<2x8x16xf32, #tpu.memory_space<vmem>>, vector<2x8x16xf32>,
    return
  }
  func.func @transform_0(%arg0: i32, %arg1: memref<4xi32, #tpu.memory_space<smem>>) -> (i32, i32, i32) {
    %c0_i32 = arith.constant 0 : i32
    %c0_i32_0 = arith.constant 0 : i32
    %c0_i32_1 = arith.constant 0 : i32
    return %arg0, %c0_i32, %c0_i32_0 : i32, i32, i32
  }
  func.func @transform_1(%arg0: i32, %arg1: memref<4xi32, #tpu.memory_space<smem>>) -> (i32, i32, i32) {
    %c0_i32 = arith.constant 0 : i32
    %c0_i32_0 = arith.constant 0 : i32
    %c0_i32_1 = arith.constant 0 : i32
    return %arg0, %c0_i32, %c0_i32_0 : i32, i32, i32
  }
  func.func @transform_2(%arg0: i32, %arg1: memref<4xi32, #tpu.memory_space<smem>>) -> (i32, i32) {
    %c0_i32 = arith.constant 0 : i32
    %c0_i32_0 = arith.constant 0 : i32
    %c0_i32_1 = arith.constant 0 : i32
    return %c0_i32, %c0_i32_0 : i32, i32
  }
  func.func @transform_3(%arg0: i32, %arg1: memref<4xi32, #tpu.memory_space<smem>>) -> (i32, i32) {
    %c0_i32 = arith.constant 0 : i32
    %c0_i32_0 = arith.constant 0 : i32
    %c0_i32_1 = arith.constant 0 : i32
    return %c0_i32, %c0_i32_0 : i32, i32
  }
  func.func @transform_4(%arg0: i32, %arg1: memref<4xi32, #tpu.memory_space<smem>>) -> (i32, i32) {
    %c0_i32 = arith.constant 0 : i32
    %c0_i32_0 = arith.constant 0 : i32
    %c0_i32_1 = arith.constant 0 : i32
    return %c0_i32, %c0_i32_0 : i32, i32
  }
  func.func @transform_5(%arg0: i32, %arg1: memref<4xi32, #tpu.memory_space<smem>>) -> (i32, i32, i32) {
    %c0_i32 = arith.constant 0 : i32
    %c0_i32_0 = arith.constant 0 : i32
    %c0_i32_1 = arith.constant 0 : i32
    return %arg0, %c0_i32, %c0_i32_0 : i32, i32, i32
  }
  func.func @transform_6(%arg0: i32, %arg1: memref<4xi32, #tpu.memory_space<smem>>) -> (i32, i32, i32) {
    %c0_i32 = arith.constant 0 : i32
    %c0_i32_0 = arith.constant 0 : i32
    %c0_i32_1 = arith.constant 0 : i32
    return %arg0, %c0_i32, %c0_i32_0 : i32, i32, i32
  }
}

</mosaic_0001>

<bundles_post_ra>
// kernel: tpu_custom_call.1
= control target key start
LH: loop header
LB: loop body
LE: loop exit
PB: predicated region body
PF: predicated region fallthrough
CT: control target
= control target key end

     0   :  { %s1285_s27 = smov [#allocation3]   ;;  %s1611_s0 = inlined_call_operand.hbm [shape: s32[4], index: 0, kind: input, shape index: {}]   ;;  %s1612_s1 = inlined_call_operand.hbm [shape: f32[4,8,128], index: 1, kind: input, shape index: {}]   ;;  %s1613_s2 = inlined_call_operand.hbm [shape: f32[4,16,128], index: 2, kind: input, shape index: {}]   ;;  %s1614_s3 = inlined_call_operand.hbm [shape: f32[128,128], index: 3, kind: input, shape index: {}]   ;;  %s1615_s4 = inlined_call_operand.hbm [shape: f32[128,128], index: 4, kind: input, shape index: {}]   ;;  %s1616_s5 = inlined_call_operand.hbm [shape: f32[128,128], index: 5, kind: input, shape index: {}]   ;;  %s1617_s6 = inlined_call_operand.hbm [shape: f32[4,8,128], index: 6, kind: output, shape index: {0}]   ;;  %s1618_s7 = inlined_call_operand.hbm [shape: f32[4,8,16], index: 7, kind: output, shape index: {1}]  }
   0x1   :  { %1624 = sst [smem:[#allocation25_spill]] %s1614_s3  ;;  %s14_s26 = sshll.u32 %s1611_s0, 4  ;;  %s15_s26 = int_to_ptr.hbm [resolvable:$true] %s14_s26 }
   0x2   :  { %1625 = sst [smem:[#allocation26_spill]] %s1615_s4 }
   0x3   :  { %1626 = sst [smem:[#allocation27_spill]] %s1616_s5 }
   0x4   :  { %17 = dma.hbm_to_smem %s15_s26, 16, %s1285_s27, [#allocation2] }
   0x5   :  { %1243 = dma.done.wait [#allocation2], 16 }
   0x6   :  { %1244 = vsyncadd [#allocation2], 4294967280 }
   0x7   :  { %20 = sfence }
   0x8   :  { %21 = vsyncpa [#allocation5], 0 }
   0x9   :  { %23 = vsyncpa [#allocation5 + $0x1], 0 }
   0xa   :  { %24 = vsyncpa [#allocation8], 0 }
   0xb   :  { %26 = vsyncpa [#allocation8 + $0x1], 0 }
   0xc   :  { %27 = vsyncpa [#allocation11], 0 }
   0xd   :  { %28 = vsyncpa [#allocation6], 0 }
   0xe   :  { %30 = vsyncpa [#allocation6 + $0x1], 0 }
   0xf   :  { %31 = vsyncpa [#allocation15], 0 }
  0x10   :  { %33 = vsyncpa [#allocation15 + $0x1], 0  ;;  %s1337_s28 = smov 0   ;;  %s1339_s29 = smov 0  }
  0x11   :  { %s1341_s0 = smov 0   ;;  %s1343_s30 = smov 0  }
  0x12 LB: > { %1627 = sst [smem:[#allocation23_spill]] %s1279_s0  ;;  %s1358_s8 = sadd.s32 4294967295, %s1283_s30   ;;  %s1283_s30 = sphi %s1343_s30, %s1645_s30   ;;  %s1279_s0 = sphi %s1341_s0, %s1642_s0   ;;  %s1275_s29 = sphi %s1339_s29, %s1644_s29   ;;  %s1271_s28 = sphi %s1337_s28, %s1643_s28  }
  0x13   : > { %s867_s9 = sadd.s32 4294967294, %s1283_s30   ;;  %p59_p0 = scmp.ne.s32.totalorder %s1275_s29, %s1271_s28 }
  0x14   : > { %p60_p1 = scmp.eq.s32.totalorder %s1358_s8, 0  ;;  %p172_p2 = scmp.eq.s32.totalorder %s1358_s8, 1 }
  0x15   : > { %p178_p3 = scmp.eq.s32.totalorder %s867_s9, 1  ;;  %p868_p5 = scmp.ge.s32.totalorder %s1283_s30, 1 }
  0x16   : > { %p1367_p4 = por %p60_p1, %p59_p0  ;;  %p211_p7 = scmp.lt.s32.totalorder %s1283_s30, 3 }
  0x17   : > { %p1372_p6 = por %p178_p3, %p59_p0  ;;  %s1630_s3 = sld [smem:[#allocation25_spill]] }
  0x18   : > { %p1380_p8 = pnand %p868_p5, %p211_p7  ;;  %s1286_s16 = smov [#allocation9]  }
  0x19   : > { %s224_s17 = sshll.u32 %s1286_s16, 4  ;;  %s1633_s4 = sld [smem:[#allocation26_spill]]  ;;  %s225_s17 = int_to_ptr.vmem [resolvable:$true] %s224_s17 }
  0x1a   : > { %p924_p9 = pneg %p1380_p8  ;;  %s1619_s22 = smov 128  }
  0x1b   : > { %s1621_s23 = smov 8   ;;  %s1289_s24 = smov [#allocation10]  }
  0x1c   : > { %p1388_p10 = pnand %p924_p9, %p60_p1  ;;  %s238_s25 = sshll.u32 %s1289_s24, 4  ;;  %s239_s25 = int_to_ptr.vmem [resolvable:$true] %s238_s25 }
  0x1d   : > { %s222_s14 = sshll.u32 %s1630_s3, 4  ;;  %s1634_s5 = sld [smem:[#allocation27_spill]]  ;;  %s223_s14 = int_to_ptr.hbm [resolvable:$true] %s222_s14 }
  0x1e   : > { %927 = dma.hbm_to_vmem [thread:$0]  (!%p1388_p10), %s223_s14, 2048, %s225_s17, [#allocation8], %s1619_s22, %s1619_s22, %s1621_s23  }
  0x1f   : > { %s236_s21 = sshll.u32 %s1633_s4, 4  ;;  %s1290_s12 = smov [#allocation12]   ;;  %s237_s21 = int_to_ptr.hbm [resolvable:$true] %s236_s21 }
  0x20   : > { %930 = dma.hbm_to_vmem [thread:$0]  (!%p1388_p10), %s237_s21, 2048, %s239_s25, [#allocation11], %s1619_s22, %s1619_s22, %s1621_s23  }
  0x21   : > { %s252_s13 = sshll.u32 %s1290_s12, 4  ;;  %s1410_s14 = sadd.s32 1, %s1283_s30   ;;  %s253_s13 = int_to_ptr.vmem [resolvable:$true] %s252_s13 }
  0x22   : > { %s43_s16 = ssub.s32 %s1283_s30, %s1410_s14  ;;  %s46_s17 = sadd.s32 1, %s1279_s0 }
  0x23   : > { %s250_s9 = sshll.u32 %s1634_s5, 4  ;;  %p44_p12 = scmp.eq.s32.totalorder %s43_s16, 0  ;;  %s251_s9 = int_to_ptr.hbm [resolvable:$true] %s250_s9 }
  0x24   : > { %933 = dma.hbm_to_vmem [thread:$0]  (!%p1388_p10), %s251_s9, 2048, %s253_s13, [#allocation11], %s1619_s22, %s1619_s22, %s1621_s23  }
  0x25   : > { %p53_p13 = scmp.ne.s32.totalorder %s1279_s0, %s1275_s29  ;;  %p54_p0 = scmp.eq.s32.totalorder %s1283_s30, 0 }
  0x26   : > { %p951_p3 = scmp.lt.s32.totalorder %s1283_s30, 2  ;;  %s1434_s18 = sand.u32 1, %s1279_s0  }
  0x27   : > { %s1425_s19 = scalar_select %p44_p12, %s1279_s0, %s46_s17  }
  0x28   : > { %p55_p5 = por %p54_p0, %p53_p13  ;;  %p1429_p7 = por %p172_p2, %p53_p13 }
  0x29   : > { %1635 = sst [smem:[#allocation24_spill]] %s1425_s19  ;;  %s899_s21 = sshll.u32 %s1283_s30, 4 }
  0x2a   : > { %s873_s24 = sshll.u32 %s1434_s18, 4  ;;  %s275_s27 = scalar_lea.hbm %s1612_s1, %s899_s21 }
  0x2b   : > { %s276_s9 = sshll.u32 %s275_s27, 4  ;;  %s270_s12 = scalar_lea.vmem [#allocation4], %s873_s24  ;;  %s277_s9 = int_to_ptr.hbm [resolvable:$true] %s276_s9 }
  0x2c   : > { %s278_s13 = sshll.u32 %s270_s12, 4  ;;  %p1443_p2 = pnand %p951_p3, %p55_p5  ;;  %s279_s13 = int_to_ptr.vmem [resolvable:$true] %s278_s13 }
  0x2d   : > { %s288_s17 = sand.u32 1, %s1283_s30   ;;  %s876_s22 = sshll.u32 %s1434_s18, 5 }
  0x2e   : > { %s267_s23 = scalar_lea.sflag [#allocation5], %s1434_s18  ;;  %s1111_s3 = sshra.s32 %s277_s9, 4  ;;  %s1112_s3 = int_to_ptr.hbm [resolvable:$true] %s1111_s3 }
  0x2f   : > { %s1113_s4 = scalar_lea.hbm %s1112_s3, 16  ;;  %p1115_p10 = pneg %p1443_p2 }
  0x30   : > { %p1114_p9 = scmp.ne.s32.totalorder %s1112_s3, %s1113_s4  ;;  %s1118_s25 = scalar_lea.hbm %s1612_s1, 32 }
  0x31   : > { %p1119_p0 = scmp.lt.s32.totalorder %s1112_s3, %s1612_s1  ;;  %p1120_p3 = scmp.lt.s32.totalorder %s1118_s25, %s1113_s4 }
  0x32   : > { %p1116_p12 = pnand %p1115_p10, %p1114_p9 }
  0x33   : > { %p1121_p5 = por %p1120_p3, %p1119_p0 }
  0x34   : > { %p1117_p13 = pneg %p1116_p12 }
  0x36   : > { %p1122_p11 = pnand %p1121_p5, %p1117_p13 }
  0x38   : > { %1125 = shalt.err (!%p1122_p11)
}
  0x39   : > { %s1638_s18 = smov 8   ;;  %s1639_s12 = smov 128  }
  0x3a   : > { %937 = dma.hbm_to_vmem [thread:$0]  (!%p1443_p2), %s277_s9, 256, %s279_s13, %s267_s23, %s1639_s12, %s1639_s12, %s1638_s18  }
  0x3b   : > { %s901_s5 = sshll.u32 %s1283_s30, 5  ;;  %s292_s19 = scalar_lea.vmem [#allocation7], %s876_s22 }
  0x3c   : > { %s301_s21 = sshll.u32 %s292_s19, 4  ;;  %s298_s26 = scalar_lea.hbm %s1613_s2, %s901_s5  ;;  %s302_s21 = int_to_ptr.vmem [resolvable:$true] %s301_s21 }
  0x3d   : > { %s299_s3 = sshll.u32 %s298_s26, 4  ;;  %s289_s4 = scalar_lea.sflag [#allocation8], %s288_s17  ;;  %s300_s3 = int_to_ptr.hbm [resolvable:$true] %s299_s3 }
  0x3e   : > { %s1141_s25 = sshra.s32 %s300_s3, 4  ;;  %s1148_s22 = scalar_lea.hbm %s1613_s2, 64  ;;  %s1142_s25 = int_to_ptr.hbm [resolvable:$true] %s1141_s25 }
  0x3f   : > { %s1143_s27 = scalar_lea.hbm %s1142_s25, 32  ;;  %p1149_p13 = scmp.lt.s32.totalorder %s1142_s25, %s1613_s2 }
  0x40   : > { %p1144_p11 = scmp.ne.s32.totalorder %s1142_s25, %s1143_s27  ;;  %p1150_p0 = scmp.lt.s32.totalorder %s1148_s22, %s1143_s27 }
  0x42   : > { %p1146_p9 = pnand %p1144_p11, %p1115_p10  ;;  %p1151_p3 = por %p1150_p0, %p1149_p13 }
  0x44   : > { %p1147_p12 = pneg %p1146_p9 }
  0x46   : > { %p1152_p5 = pnand %p1151_p3, %p1147_p12 }
  0x48   : > { %1155 = shalt.err (!%p1152_p5)
}
  0x49   : > { %940 = dma.hbm_to_vmem [thread:$0]  (!%p1443_p2), %s300_s3, 512, %s302_s21, %s289_s4, %s1639_s12, %s1639_s12, %s1638_s18  }
  0x4a   : > { %313 = sbr.rel (%p1380_p8) target bundleno = 927 (0x39f), region = 40  ;;  %s1487_s5 = sand.u32 (!%p1380_p8), 1, %s1275_s29  }
  0x4b   : > { %s1490_s0 = sshll.u32 (!%p1380_p8), %s1487_s5, 4  ;;  %s316_s17 = scalar_lea.sflag (!%p1380_p8), [#allocation5], %s1487_s5 }
  0x4c   : > { %s319_s24 = scalar_lea.vmem (!%p1380_p8), [#allocation4], %s1490_s0 }
  0x4f   : > { %1246 = dma.done.wait (%p1367_p4), %s316_s17, 256  }
  0x50   : > { %1248 = vsyncadd (%p1367_p4), %s316_s17, 4294967040  ;;  %s325_s15 = sand.u32 1, %s1358_s8   ;;  %s882_s16 = sshll.u32 %s1487_s5, 5 }
  0x51   : > { %s326_s18 = scalar_lea.sflag [#allocation8], %s325_s15  ;;  %s1500_s12 = scalar_lea.vmem [#allocation7], %s882_s16 }
  0x52   : > { %1250 = dma.done.wait (%p1367_p4), %s326_s18, 512  }
  0x53   : > { %1252 = vsyncadd (%p1367_p4), %s326_s18, 4294966784 }
  0x54   : > { %1254 = dma.done.wait (%p60_p1), [#allocation8], 2048  }
  0x55   : > { %1256 = vsyncadd (%p60_p1), [#allocation8], 4294965248 }
  0x56   : > { %1258 = dma.done.wait (%p60_p1), [#allocation11], 4096  }
  0x57   : > { %1260 = vsyncadd (%p60_p1), [#allocation11], 4294963200  ;;  %v409_v0 = vld [vmem:[#allocation9 + $0x78] sm:$0xff]  ;;  %v408_v1 = vld [vmem:[#allocation9 + $0x70] sm:$0xff]  ;;  %s888_s10 = sshll.u32 %s1358_s8, 1  ;;  %v434_v24 = vlaneseq  ;;  %vm445_vm2 = vcmask 1040384  }
  0x58   : > { %410 = vmatpush.msra.mxu0 %v409_v0  ;;  %v407_v2 = vld [vmem:[#allocation9 + $0x68] sm:$0xff]  ;;  %v406_v3 = vld [vmem:[#allocation9 + $0x60] sm:$0xff]  ;;  %v405_v4 = vld [vmem:[#allocation9 + $0x58] sm:$0xff]  ;;  %s440_s21 = sadd.s32 1, %s888_s10  ;;  %s436_s26 = sld [smem:[#allocation3 + %s888_s10]]  ;;  %vm493_vm3 = vcmask 130048  }
  0x59   : > { %v404_v5 = vld [vmem:[#allocation9 + $0x50] sm:$0xff]  ;;  %v391_v6 = vld [vmem:[%s1500_s12 + $0x8] sm:$0xff]  ;;  %v390_v8 = vld [vmem:[%s1500_s12] sm:$0xff]  ;;  %s441_s3 = sld [smem:[#allocation3 + %s440_s21]]  ;;  %v435_v25 = vand.u32 127, %v434_v24  ;;  %s1542_s4 = scalar_lea.vmem [#allocation14], %s1490_s0 }
  0x5a   : > { %411 = vmatpush.msra.mxu0 %v408_v1  ;;  %467 = vmatpush.xpose.msra.mxu3 %v391_v6  ;;  %v403_v7 = vld [vmem:[#allocation9 + $0x48] sm:$0xff]  ;;  %v402_v9 = vld [vmem:[#allocation9 + $0x40] sm:$0xff]  ;;  %v401_v10 = vld [vmem:[#allocation9 + $0x38] sm:$0xff]  ;;  %v1291_v28 = vmov -1e+30   ;;  %s902_s25 = sshll.u32 %s1358_s8, 4 }
  0x5b   : > { %v400_v11 = vld [vmem:[#allocation9 + $0x30] sm:$0xff]  ;;  %v399_v12 = vld [vmem:[#allocation9 + $0x28] sm:$0xff]  ;;  %v398_v13 = vld [vmem:[#allocation9 + $0x20] sm:$0xff]  ;;  %s706_s9 = scalar_lea.hbm %s1618_s7, %s902_s25  ;;  %s707_s22 = sshll.u32 %s1542_s4, 4  ;;  %s708_s22 = int_to_ptr.vmem [resolvable:$true] %s707_s22 }
  0x5c   : > { %412 = vmatpush.msra.mxu0 %v407_v2  ;;  %v397_v14 = vld [vmem:[#allocation9 + $0x18] sm:$0xff]  ;;  %v396_v15 = vld [vmem:[#allocation9 + $0x10] sm:$0xff]  ;;  %v395_v16 = vld [vmem:[#allocation9 + $0x8] sm:$0xff]  ;;  %s709_s19 = sshll.u32 %s706_s9, 4  ;;  %s678_s13 = scalar_lea.sflag [#allocation15], %s1487_s5  ;;  %s710_s19 = int_to_ptr.hbm [resolvable:$true] %s709_s19 }
  0x5d   : > { %v394_v17 = vld [vmem:[#allocation9] sm:$0xff]  ;;  %v1523_v19 = vld [vmem:[%s319_s24 + $0x8] sm:$0xff]  ;;  %v392_v21 = vld [vmem:[%s1500_s12 + $0x10] sm:$0xff]  ;;  %s1185_s17 = sshra.s32 %s710_s19, 4  ;;  %s1191_s18 = scalar_lea.hbm %s1618_s7, 32  ;;  %s1186_s17 = int_to_ptr.hbm [resolvable:$true] %s1185_s17 }
  0x5e   : > { %413 = vmatpush.msra.mxu0 %v406_v3  ;;  %468 = vmatpush.xpose.msra.mxu3 %v390_v8  ;;  %v1518_v18 = vld [vmem:[%s319_s24] sm:$0xff]  ;;  %v393_v20 = vld [vmem:[%s1500_s12 + $0x18] sm:$0xff]  ;;  %v437_v26 = vstv %s436_s26  ;;  %v601_v55 = vld [vmem:[#allocation10 + $0x68] sm:$0xff]  ;;  %s1187_s24 = scalar_lea.hbm %s1186_s17, 16  ;;  %p1192_p2 = scmp.lt.s32.totalorder %s1186_s17, %s1618_s7 }
  0x5f   : > { %v442_v27 = vstv %s441_s3  ;;  %vm438_vm0 = vcmp.lt.s32.totalorder %v435_v25, %v437_v26  ;;  %v603_v51 = vld [vmem:[#allocation10 + $0x78] sm:$0xff]  ;;  %v602_v52 = vld [vmem:[#allocation10 + $0x70] sm:$0xff]  ;;  %v617_v56 = vld [vmem:[#allocation12 + $0x68] sm:$0xff]  ;;  %p1188_p1 = scmp.ne.s32.totalorder %s1186_s17, %s1187_s24  ;;  %p1193_p10 = scmp.lt.s32.totalorder %s1191_s18, %s1187_s24 }
  0x60   : > { %414 = vmatpush.msra.mxu0 %v405_v4  ;;  %vm443_vm1 = vcmp.lt.s32.totalorder %v435_v25, %v442_v27  ;;  %v439_v29 = vsel %vm438_vm0, 0.0, %v1291_v28  ;;  %643 = vmatpush.msra.mxu2 %v603_v51  ;;  %v619_v53 = vld [vmem:[#allocation12 + $0x78] sm:$0xff]  ;;  %v618_v54 = vld [vmem:[#allocation12 + $0x70] sm:$0xff]  ;;  %v600_v58 = vld [vmem:[#allocation10 + $0x60] sm:$0xff] }
  0x61   : > { %v444_v30 = vsel %vm443_vm1, 0.0, %v1291_v28  ;;  %620 = vmatpush.msra.mxu1 %v619_v53  ;;  %v616_v59 = vld [vmem:[#allocation12 + $0x60] sm:$0xff]  ;;  %v599_v60 = vld [vmem:[#allocation10 + $0x58] sm:$0xff]  ;;  %v598_v62 = vld [vmem:[#allocation10 + $0x50] sm:$0xff]  ;;  %p1189_p4 = pnand %p1188_p1, %p1429_p7  ;;  %p1194_p11 = por %p1193_p10, %p1192_p2 }
  0x62   : > { %415 = vmatpush.msra.mxu0 %v404_v5  ;;  %487 = vmatpush.xpose.msrb.mxu3 %v393_v20  ;;  %v446_v31 = vsel %vm445_vm2, %v439_v29, %v444_v30  ;;  %v615_v61 = vld [vmem:[#allocation12 + $0x58] sm:$0xff]  ;;  %v614_v63 = vld [vmem:[#allocation12 + $0x50] sm:$0xff]  ;;  %v597_v0 = vld [vmem:[#allocation10 + $0x48] sm:$0xff] }
  0x63   : > { %v449_v32 = vperm.slane %v446_v31, 0  ;;  %v448_v35 = vrot.slane %v446_v31, 1  ;;  %644 = vmatpush.msra.mxu2 %v602_v52  ;;  %621 = vmatpush.msra.mxu1 %v618_v54  ;;  %v613_v2 = vld [vmem:[#allocation12 + $0x48] sm:$0xff]  ;;  %v596_v5 = vld [vmem:[#allocation10 + $0x40] sm:$0xff]  ;;  %v591_v29 = vld [vmem:[#allocation10 + $0x18] sm:$0xff]  ;;  %p1190_p8 = pneg %p1189_p4 }
  0x64   : > { %416 = vmatpush.msra.mxu0 %v403_v7  ;;  %v592_v24 = vld [vmem:[#allocation10 + $0x20] sm:$0xff] }
  0x65   : > { %v450_v37 = vperm.slane %v448_v35, 0  ;;  %645 = vmatpush.msra.mxu2 %v601_v55  ;;  %622 = vmatpush.msra.mxu1 %v617_v56  ;;  %v608_v26 = vld [vmem:[#allocation12 + $0x20] sm:$0xff]  ;;  %v589_v35 = vld [vmem:[#allocation10 + $0x8] sm:$0xff]  ;;  %p1195_p9 = pnand %p1194_p11, %p1190_p8 }
  0x66   : > { %417 = vmatpush.msra.mxu0 %v402_v9  ;;  %488 = vmatpush.xpose.msrb.mxu3 %v392_v21 }
  0x67   : > { %646 = vmatpush.msra.mxu2 %v600_v58  ;;  %623 = vmatpush.msra.mxu1 %v616_v59 }
  0x68   : > { %418 = vmatpush.msra.mxu0 %v401_v10  ;;  %v611_v10 = vld [vmem:[#allocation12 + $0x38] sm:$0xff] }
  0x69   : > { %647 = vmatpush.msra.mxu2 %v599_v60  ;;  %624 = vmatpush.msra.mxu1 %v615_v61 }
  0x6a   : > { %419 = vmatpush.msra.mxu0 %v400_v11 }
  0x6b   : > { %648 = vmatpush.msra.mxu2 %v598_v62  ;;  %625 = vmatpush.msra.mxu1 %v614_v63 }
  0x6c   : > { %420 = vmatpush.msra.mxu0 %v399_v12 }
  0x6d   : > { %649 = vmatpush.msra.mxu2 %v597_v0  ;;  %626 = vmatpush.msra.mxu1 %v613_v2 }
  0x6e   : > { %421 = vmatpush.msra.mxu0 %v398_v13  ;;  %v594_v13 = vld [vmem:[#allocation10 + $0x30] sm:$0xff] }
  0x6f   : > { %650 = vmatpush.msra.mxu2 %v596_v5 }
  0x70   : > { %422 = vmatpush.msra.mxu0 %v397_v14  ;;  %v610_v14 = vld [vmem:[#allocation12 + $0x30] sm:$0xff] }
  0x72   : > { %423 = vmatpush.msra.mxu0 %v396_v15 }
  0x74   : > { %424 = vmatpush.msra.mxu0 %v395_v16  ;;  %v593_v16 = vld [vmem:[#allocation10 + $0x28] sm:$0xff] }
  0x76   : > { %425 = vmatpush.msra.mxu0 %v394_v17 }
  0x77   : > { %426 = vmatmul.f32.vlgmr.msra.gmra.mxu0 %v1518_v18 }
  0x7f   : > { %429 = vmatmul.f32.gmra.mxu0 %v1523_v19 }
  0xf4   : > { %v427_v22 = vpop.f32.mrf.mxu0 }
  0xf5   : > { %469 = vmatmul.f32.vlgmr.msra.gmra.mxu3 %v427_v22 }
  0xf6   : > { %559 = vmatpush.msra.mxu3 %v391_v6  ;;  %v612_v6 = vld [vmem:[#allocation12 + $0x40] sm:$0xff] }
  0xf7   : > { %627 = vmatpush.msra.mxu1 %v612_v6 }
  0xf8   : > { %560 = vmatpush.msra.mxu3 %v390_v8  ;;  %v595_v8 = vld [vmem:[#allocation10 + $0x38] sm:$0xff] }
  0xf9   : > { %651 = vmatpush.msra.mxu2 %v595_v8  ;;  %628 = vmatpush.msra.mxu1 %v611_v10 }
  0xfb   : > { %652 = vmatpush.msra.mxu2 %v594_v13  ;;  %629 = vmatpush.msra.mxu1 %v610_v14 }
  0xfc   : > { %v430_v23 = vpop.f32.mrf.mxu0 }
  0xfd   : > { %489 = vmatmul.f32.vlgmr.msrb.gmra.mxu3 %v430_v23  ;;  %653 = vmatpush.msra.mxu2 %v593_v16 }
  0xfe   : > { %582 = vmatpush.msrb.mxu3 %v393_v20 }
  0xff   : > { %654 = vmatpush.msra.mxu2 %v592_v24 }
 0x100   : > { %583 = vmatpush.msrb.mxu3 %v392_v21  ;;  %v609_v21 = vld [vmem:[#allocation12 + $0x28] sm:$0xff] }
 0x101   : > { %630 = vmatpush.msra.mxu1 %v609_v21  ;;  %655 = vmatpush.msra.mxu2 %v591_v29 }
 0x103   : > { %631 = vmatpush.msra.mxu1 %v608_v26 }
 0x178   : > { %v470_v33 = vpop.f32.mrf.mxu3 }
 0x179   : > { %v471_v34 = vadd.f32 %v470_v33, %v449_v32  ;;  %v590_v33 = vld [vmem:[#allocation10 + $0x10] sm:$0xff] }
 0x17a   : > { %656 = vmatpush.msra.mxu2 %v590_v33 }
 0x17b   : > { %v494_v36 = vsel %vm493_vm3, %v471_v34, -inf }
 0x17c   : > { %495 = vmax.xlane.f32.xlu0 %v494_v36  ;;  %657 = vmatpush.msra.mxu2 %v589_v35 }
 0x180   : > { %v490_v38 = vpop.f32.mrf.mxu3 }
 0x181   : > { %v491_v39 = vadd.f32 %v490_v38, %v450_v37 }
 0x183   : > { %v497_v40 = vsel %vm493_vm3, %v491_v39, -inf }
 0x184   : > { %498 = vmax.xlane.f32.xlu0 %v497_v40  ;;  %v607_v40 = vld [vmem:[#allocation12 + $0x18] sm:$0xff] }
 0x185   : > { %632 = vmatpush.msra.mxu1 %v607_v40 }
 0x1ef   : > { %v496_v41 = vpop.xlane.xlu0 %495 }
 0x1f0   : > { %v500_v42 = vsub.f32 %v471_v34, %v496_v41  ;;  %v588_v41 = vld [vmem:[#allocation10] sm:$0xff] }
 0x1f1   : > { %658 = vmatpush.msra.mxu2 %v588_v41 }
 0x1f2   : > { %v502_v43 = vmul.f32 1.442695, %v500_v42  ;;  %v606_v42 = vld [vmem:[#allocation12 + $0x10] sm:$0xff] }
 0x1f3   : > { %633 = vmatpush.msra.mxu1 %v606_v42 }
 0x1f4   : > { %997 = vpow2.f32 %v502_v43  ;;  %v605_v43 = vld [vmem:[#allocation12 + $0x8] sm:$0xff] }
 0x1f5   : > { %634 = vmatpush.msra.mxu1 %v605_v43 }
 0x1f7   : > { %v499_v44 = vpop.xlane.xlu0 %498 }
 0x1f8   : > { %v501_v45 = vsub.f32 %v491_v39, %v499_v44  ;;  %v604_v44 = vld [vmem:[#allocation12] sm:$0xff] }
 0x1f9   : > { %635 = vmatpush.msra.mxu1 %v604_v44 }
 0x1fa   : > { %v1531_v46 = vpop.eup %997  ;;  %v504_v47 = vmul.f32 1.442695, %v501_v45  ;;  %636 = vmatmul.f32.vlgmr.msra.gmra.mxu1 %v1518_v18 }
 0x1fb   : > { %v506_v48 = vsel %vm493_vm3, %v1531_v46, 0.0 }
 0x1fc   : > { %999 = vpow2.f32 %v504_v47  ;;  %507 = vadd.xlane.f32.xlu1 %v506_v48 }
 0x202   : > { %v1535_v49 = vpop.eup %999  ;;  %639 = vmatmul.f32.gmra.mxu1 %v1523_v19 }
 0x203   : > { %v509_v50 = vsel %vm493_vm3, %v1535_v49, 0.0 }
 0x204   : > { %510 = vadd.xlane.f32.xlu1 %v509_v50 }
 0x26f   : > { %v508_v57 = vpop.xlane.xlu1 %507 }
 0x270   : > { %1001 = vrcp.f32 %v508_v57  ;;  %v523_v9 = vand.u32 2147483648, %v508_v57  ;;  %v521_v12 = vand.u32 2147483647, %v508_v57  ;;  %vm517_vm5 = vweird.f32 %v508_v57 }
 0x272   : > { %v524_v20 = vor.u32 1.1754944e-38, %v523_v9  ;;  %vm522_vm7 = vcmp.eq.f32.partialorder %v521_v12, 8.507059e+37 }
 0x276   : > { %v1002_v1 = vpop.eup %1001 }
 0x277   : > { %v513_v3 = vmul.f32 %v1002_v1, %v508_v57  ;;  %v511_v4 = vpop.xlane.xlu1 %510  ;;  %vm518_vm4 = vweird.f32 %v1002_v1 }
 0x278   : > { %1003 = vrcp.f32 %v511_v4  ;;  %vm519_vm6 = vmor %vm517_vm5, %vm518_vm4  ;;  %v538_v30 = vand.u32 2147483648, %v511_v4  ;;  %v536_v32 = vand.u32 2147483647, %v511_v4  ;;  %vm532_vm9 = vweird.f32 %v511_v4 }
 0x279   : > { %v514_v7 = vsub.f32 1.0, %v513_v3 }
 0x27a   : > { %v539_v36 = vor.u32 1.1754944e-38, %v538_v30  ;;  %vm537_vm11 = vcmp.eq.f32.partialorder %v536_v32, 8.507059e+37 }
 0x27b   : > { %v515_v11 = vmul.f32 %v1002_v1, %v514_v7 }
 0x27d   : > { %v516_v15 = vadd.f32 %v1002_v1, %v515_v11 }
 0x27e   : > { %v1004_v17 = vpop.eup %1003 }
 0x27f   : > { %v520_v22 = vsel %vm519_vm6, %v1002_v1, %v516_v15  ;;  %v528_v23 = vmul.f32 %v1004_v17, %v511_v4  ;;  %vm533_vm8 = vweird.f32 %v1004_v17 }
 0x280   : > { %v525_v25 = vsel %vm522_vm7, %v524_v20, %v520_v22  ;;  %vm534_vm10 = vmor %vm532_vm9, %vm533_vm8 }
 0x281   : > { %v529_v27 = vsub.f32 1.0, %v528_v23  ;;  %v526_v28 = vmul.f32 %v1531_v46, %v525_v25 }
 0x283   : > { %v530_v31 = vmul.f32 %v1004_v17, %v529_v27  ;;  %889 = vmatmul.msk.f32.vlgmr.msra.gmra.mxu3 %vm493_vm3, %v526_v28  ;;  %670 = vst.msk [vmem:[%s1542_s4] sm:$0xff] %vm493_vm3, %v526_v28 }
 0x285   : > { %v531_v34 = vadd.f32 %v1004_v17, %v530_v31 }
 0x287   : > { %v535_v37 = vsel %vm534_vm10, %v1004_v17, %v531_v34 }
 0x288   : > { %v540_v38 = vsel %vm537_vm11, %v539_v36, %v535_v37 }
 0x289   : > { %v541_v39 = vmul.f32 %v1535_v49, %v540_v38 }
 0x28b   : > { %890 = vmatmul.msk.f32.vlgmr.msrb.gmra.mxu3 %vm493_vm3, %v541_v39  ;;  %671 = vst.msk [vmem:[%s1542_s4 + $0x8] sm:$0xff] %vm493_vm3, %v541_v39 }
 0x306   : > { %v562_v45 = vpop.f32.mrf.mxu3 }
 0x307   : > { %659 = vmatmul.f32.vlgmr.msra.gmra.mxu2 %v562_v45 }
 0x30e   : > { %v585_v46 = vpop.f32.mrf.mxu3 }
 0x30f   : > { %662 = vmatmul.f32.gmra.mxu2 %v585_v46 }
 0x310   : > { %1198 = shalt.err (!%p1195_p9)
}
 0x311   : > { %s1292_s21 = smov 128   ;;  %s1293_s26 = smov 8   ;;  %v637_v18 = vpop.f32.mrf.mxu1 }
 0x312   : > { %921 = dma.vmem_to_hbm [thread:$0]  (%p1429_p7), %s708_s22, 256, %s710_s19, %s678_s13, %s1292_s21, %s1292_s21, %s1293_s26  }
 0x313   : > { %s376_s3 = scalar_lea.vmem [#allocation13], %s1490_s0  ;;  %s689_s23 = scalar_lea.hbm %s1617_s6, %s902_s25 }
 0x314   : > { %s690_s9 = sshll.u32 %s376_s3, 4  ;;  %s692_s22 = sshll.u32 %s689_s23, 4  ;;  %s691_s9 = int_to_ptr.vmem [resolvable:$true] %s690_s9  ;;  %s693_s22 = int_to_ptr.hbm [resolvable:$true] %s692_s22 }
 0x315   : > { %s673_s19 = scalar_lea.sflag [#allocation6], %s1487_s5  ;;  %s1213_s13 = sshra.s32 %s693_s22, 4  ;;  %s1214_s13 = int_to_ptr.hbm [resolvable:$true] %s1213_s13 }
 0x316   : > { %s1215_s17 = scalar_lea.hbm %s1214_s13, 16  ;;  %s1219_s24 = scalar_lea.hbm %s1617_s6, 32 }
 0x317   : > { %p1216_p12 = scmp.ne.s32.totalorder %s1214_s13, %s1215_s17  ;;  %p1220_p3 = scmp.lt.s32.totalorder %s1214_s13, %s1617_s6 }
 0x318   : > { %p1221_p5 = scmp.lt.s32.totalorder %s1219_s24, %s1215_s17 }
 0x319   : > { %v640_v48 = vpop.f32.mrf.mxu1  ;;  %p1217_p13 = pnand %p1216_p12, %p1429_p7 }
 0x31a   : > { %p1222_p1 = por %p1221_p5, %p1220_p3 }
 0x31b   : > { %p1218_p0 = pneg %p1217_p13 }
 0x31d   : > { %p1223_p4 = pnand %p1222_p1, %p1218_p0 }
 0x38a   : > { %v660_v19 = vpop.f32.mrf.mxu2 }
 0x38b   : > { %v661_v47 = vadd.f32 %v660_v19, %v637_v18 }
 0x38d   : > { %1005 = vtanh.f32 %v661_v47 }
 0x392   : > { %v663_v49 = vpop.f32.mrf.mxu2 }
 0x393   : > { %v1006_v50 = vpop.eup %1005  ;;  %v664_v51 = vadd.f32 %v663_v49, %v640_v48 }
 0x394   : > { %668 = vst [vmem:[%s376_s3] sm:$0xff] %v1006_v50 }
 0x395   : > { %1007 = vtanh.f32 %v664_v51 }
 0x39b   : > { %v1008_v52 = vpop.eup %1007 }
 0x39c   : > { %669 = vst [vmem:[%s376_s3 + $0x8] sm:$0xff] %v1008_v52 }
 0x39d   : > { %1226 = shalt.err (!%p1223_p4)
}
 0x39e   : > { %920 = dma.vmem_to_hbm [thread:$0]  (%p1429_p7), %s691_s9, 256, %s693_s22, %s673_s19, %s1292_s21, %s1292_s21, %s1293_s26  }
 0x39f PF: > { %s724_s5 = sand.u32 1, %s1271_s28   ;;  %p1640_p8 = scmp.ge.s32.totalorder %s1283_s30, 2 }
 0x3a0   : > { %s725_s16 = scalar_lea.sflag [#allocation6], %s724_s5 }
 0x3a1   : > { %p942_p2 = pnand %p1640_p8, %p1372_p6 }
 0x3a3   : > { %p943_p10 = pneg %p942_p2 }
 0x3a5   : > { %1262 = dma.done.wait (%p943_p10), %s725_s16, 256  }
 0x3a6   : > { %1264 = vsyncadd (%p943_p10), %s725_s16, 4294967040  ;;  %s735_s18 = scalar_lea.sflag [#allocation15], %s724_s5 }
 0x3a7   : > { %1266 = dma.done.wait (%p943_p10), %s735_s18, 256  }
 0x3a8   : > { %1268 = vsyncadd (%p943_p10), %s735_s18, 4294967040  ;;  %s1641_s20 = sld [smem:[#allocation23_spill]]  ;;  %p36_p7 = scmp.ge.s32.totalorder %s1410_s14, 4  }
 0x3a9   : > { %s1642_s0 = sld [smem:[#allocation24_spill]]  ;;  %s1643_s28 = smov %s1275_s29 }
 0x3aa   : > { %s1645_s30 = smov %s1410_s14  ;;  %38 = sbr.rel (!%p36_p7) target bundleno = 18 (0x12), region = 127 }
 0x3ae   : > { %s1644_s29 = smov %s1641_s20 }
 0x3af   :  { %741 = vsyncpa [#allocation5], 1 }
 0x3b0   :  { %743 = vsyncpa [#allocation5 + $0x1], 1 }
 0x3b1   :  { %744 = vsyncpa [#allocation8], 1 }
 0x3b2   :  { %746 = vsyncpa [#allocation8 + $0x1], 1 }
 0x3b3   :  { %747 = vsyncpa [#allocation11], 1 }
 0x3b4   :  { %748 = vsyncpa [#allocation6], 1 }
 0x3b5   :  { %750 = vsyncpa [#allocation6 + $0x1], 1 }
 0x3b6   :  { %751 = vsyncpa [#allocation15], 1 }
 0x3b7   :  { %753 = vsyncpa [#allocation15 + $0x1], 1 }

</bundles_post_ra>
